<compile_context>
chip_gen: v6e
topology: v6e:2x2x1
jax: 0.10.0
libtpu: 0.0.40
codegen_flags: <defaults>
</compile_context>

<pallas_src>
import jax
import jax.numpy as jnp
from jax.experimental import pallas as pl
from jax.experimental.pallas import tpu as pltpu


def _denorm_kernel(scale_ref, offset_ref, x_ref, o_ref):
    # scale_ref / offset_ref: (R, 1) f32 per-row scalars (already include the 10000 factor)
    # x_ref / o_ref:          (R, Bc) data tile
    # Compute in f32; kernel is HBM-bound so the upcast is not the binding slot even for bf16.
    x = x_ref[...].astype(jnp.float32)
    o_ref[...] = (x * scale_ref[...] + offset_ref[...]).astype(o_ref.dtype)


def _vmem_capacity_bytes() -> int:
    """Physical VMEM of the local chip; conservative fallback = v7x (64 MiB)."""
    try:
        info = pltpu.get_tpu_info()
        cap = int(getattr(info, "vmem_capacity_bytes", 0))
        if cap > 0:
            return cap
    except Exception:
        pass
    return 64 << 20


def _target_tile_bytes(vmem_cap: int) -> int:
    """Per-tile byte target: 2 in + 2 out data tiles within ~60% of physical VMEM,
    capped at 16 MiB/tile (v5e/v6e), ~9.6 MiB/tile on v7x."""
    budget = int(vmem_cap * 0.6)
    return max(1 << 20, min(16 << 20, budget // 4))


def _pick_block(nc: int, hw: int, dtype, target_bytes: int):
    """Choose a (rows, cols) block near `target_bytes` respecting (sublane, 128) tiling."""
    itemsize = jnp.dtype(dtype).itemsize
    sub = max(8, 32 // itemsize)  # sublane packing: 8 f32, 16 bf16, 32 int8/fp8

    # Size columns assuming at least `sub` rows per tile (prevents the old 8x overshoot
    # once rows get rounded up to the packing multiple).
    col_budget = max(128, target_bytes // (sub * itemsize))
    if hw <= col_budget or hw <= 128:
        bc = hw  # full row extent (lane-dense whenever hw % 128 == 0)
        # TODO(synk): pad hw to a multiple of 128 for tiny/odd feature maps to avoid
        # masked vst.msk stores; not needed for typical H*W.
    else:
        bc = max(128, (col_budget // 128) * 128)  # large multiple of 128

    rows_target = max(1, target_bytes // (bc * itemsize))
    if nc <= sub:
        br = nc  # full sublane extent (block == array dim is always legal)
    else:
        br = min(nc, max(sub, (rows_target // sub) * sub))
    return br, bc, sub


def _ensure_min_programs(nc: int, hw: int, br: int, bc: int, sub: int):
    """Guarantee >= 2 grid programs when possible so both v7x TensorCores get work."""
    if pl.cdiv(nc, br) * pl.cdiv(hw, bc) >= 2:
        return br, bc
    if nc >= 2 * sub:
        half_r = ((nc // 2 + sub - 1) // sub) * sub
        if half_r < nc:
            return half_r, bc
    if hw >= 256:
        half_c = ((hw // 2 + 127) // 128) * 128
        if half_c < hw:
            return br, half_c
    return br, bc


def post_processing(data: jax.Array, mean: jax.Array, std: jax.Array,
                    donate_input: bool = False) -> jax.Array:
    """data: (N, C, H, W); mean/std: (C,). Returns 10000 * (mean + data * std), per channel."""
    N, C, H, W = data.shape
    nc, hw = N * C, H * W

    # Lane-dense flat view of the NCHW tensor (contiguous -> free reshape).
    x2d = data.reshape(nc, hw)

    # Per-row scale/offset with the 10000 folded in (tiny, computed once).
    scale = jnp.tile(10000.0 * std.astype(jnp.float32), N).reshape(nc, 1)
    offset = jnp.tile(10000.0 * mean.astype(jnp.float32), N).reshape(nc, 1)

    itemsize = jnp.dtype(data.dtype).itemsize
    vmem_cap = _vmem_capacity_bytes()
    target_bytes = _target_tile_bytes(vmem_cap)
    br, bc, sub = _pick_block(nc, hw, data.dtype, target_bytes)
    br, bc = _ensure_min_programs(nc, hw, br, bc, sub)
    grid = (pl.cdiv(nc, br), pl.cdiv(hw, bc))

    # Explicit scoped VMEM: 2x double-buffered (in + out) data tiles + headroom for
    # scale/offset buffers and internal scratch; clamped to physical capacity.
    tile_bytes = br * bc * itemsize
    vmem_limit = int(min(max(2 * 2 * tile_bytes + (4 << 20), 16 << 20), vmem_cap))

    out2d = pl.pallas_call(
        _denorm_kernel,
        out_shape=jax.ShapeDtypeStruct((nc, hw), data.dtype),
        grid_spec=pltpu.PrefetchScalarGridSpec(
            num_scalar_prefetch=0,
            grid=grid,
            in_specs=[
                pl.BlockSpec((br, 1), lambda i, j: (i, 0)),   # per-row scale (10000*std)
                pl.BlockSpec((br, 1), lambda i, j: (i, 0)),   # per-row offset (10000*mean)
                pl.BlockSpec((br, bc), lambda i, j: (i, j)),  # data tile
            ],
            out_specs=pl.BlockSpec((br, bc), lambda i, j: (i, j)),
        ),
        compiler_params=pltpu.CompilerParams(
            dimension_semantics=("parallel", "parallel"),
            vmem_limit_bytes=vmem_limit,
        ),
        # Alias the (nc, hw) data input to the output when the caller donates it:
        # saves one N*C*H*W HBM allocation (footprint win, not a bandwidth win).
        input_output_aliases=({2: 0} if donate_input else {}),
    )(scale, offset, x2d)

    return out2d.reshape(N, C, H, W)


if __name__ == "__main__":
    key = jax.random.PRNGKey(0)
    k1, k2, k3 = jax.random.split(key, 3)

    N, C, H, W = 2, 4, 16, 16
    data = jax.random.normal(k1, (N, C, H, W), dtype=jnp.float32)
    mean = jax.random.normal(k2, (C,), dtype=jnp.float32)
    std = jax.random.uniform(k3, (C,), dtype=jnp.float32, minval=0.5, maxval=1.5)

    out = post_processing(data, mean, std)
    out = jax.block_until_ready(out)

    # reference (plain JAX) for sanity
    ref = 10000.0 * (mean[None, :, None, None] + data * std[None, :, None, None])
    assert out.shape == (N, C, H, W)
    assert jnp.allclose(out, ref, rtol=1e-5, atol=1e-2), "mismatch vs reference"

    print("KERNEL_OK")
</pallas_src>

<mosaic_0001>
module attributes {stable_mosaic.version = 11 : i64} {
  func.func @_denorm_kernel(%arg0: i32, %arg1: i32, %arg2: memref<8x1xf32, #tpu.memory_space<vmem>>, %arg3: memref<8x1xf32, #tpu.memory_space<vmem>>, %arg4: memref<8x128xf32, #tpu.memory_space<vmem>>, %arg5: memref<8x128xf32, #tpu.memory_space<vmem>>) attributes {dimension_semantics = [#tpu.dimension_semantics<parallel>, #tpu.dimension_semantics<parallel>], iteration_bounds = array<i64: 1, 2>, scalar_prefetch = 0 : i64, scratch_operands = 0 : i64, tpu.core_type = #tpu.core_type<tc>, window_params = [{transform_indices = @transform_0, window_bounds = array<i64: 8, 1>}, {transform_indices = @transform_1, window_bounds = array<i64: 8, 1>}, {transform_indices = @transform_2, window_bounds = array<i64: 8, 128>}, {transform_indices = @transform_3, window_bounds = array<i64: 8, 128>}]} {
    %c0 = arith.constant 0 : index
    %c0_0 = arith.constant 0 : index
    %0 = vector.load %arg4[%c0, %c0_0] : memref<8x128xf32, #tpu.memory_space<vmem>>, vector<8x128xf32>
    %c0_1 = arith.constant 0 : index
    %c0_2 = arith.constant 0 : index
    %1 = vector.load %arg2[%c0_1, %c0_2] : memref<8x1xf32, #tpu.memory_space<vmem>>, vector<8x1xf32>
    %2 = vector.broadcast %1 : vector<8x1xf32> to vector<8x128xf32>
    %3 = arith.mulf %0, %2 : vector<8x128xf32>
    %c0_3 = arith.constant 0 : index
    %c0_4 = arith.constant 0 : index
    %4 = vector.load %arg3[%c0_3, %c0_4] : memref<8x1xf32, #tpu.memory_space<vmem>>, vector<8x1xf32>
    %5 = vector.broadcast %4 : vector<8x1xf32> to vector<8x128xf32>
    %6 = arith.addf %3, %5 : vector<8x128xf32>
    %c0_5 = arith.constant 0 : index
    %c0_6 = arith.constant 0 : index
    %7 = vector.load %arg5[%c0_5, %c0_6] : memref<8x128xf32, #tpu.memory_space<vmem>>, vector<8x128xf32>
    tpu.vector_store %arg5[%c0_5, %c0_6], %6 {strides = array<i32>} : memref<8x128xf32, #tpu.memory_space<vmem>>, vector<8x128xf32>,
    return
  }
  func.func @transform_0(%arg0: i32, %arg1: i32) -> (i32, i32) {
    %c0_i32 = arith.constant 0 : i32
    %c0_i32_0 = arith.constant 0 : i32
    return %arg0, %c0_i32 : i32, i32
  }
  func.func @transform_1(%arg0: i32, %arg1: i32) -> (i32, i32) {
    %c0_i32 = arith.constant 0 : i32
    %c0_i32_0 = arith.constant 0 : i32
    return %arg0, %c0_i32 : i32, i32
  }
  func.func @transform_2(%arg0: i32, %arg1: i32) -> (i32, i32) {
    %c0_i32 = arith.constant 0 : i32
    return %arg0, %arg1 : i32, i32
  }
  func.func @transform_3(%arg0: i32, %arg1: i32) -> (i32, i32) {
    %c0_i32 = arith.constant 0 : i32
    return %arg0, %arg1 : i32, i32
  }
}

</mosaic_0001>

<bundles_post_ra>
// kernel: tpu_custom_call.1
= control target key start
LH: loop header
LB: loop body
LE: loop exit
PB: predicated region body
PF: predicated region fallthrough
CT: control target
= control target key end

     0   :  { %8 = vsyncpa [#allocation3], 0  ;;  %s640_s0 = inlined_call_operand.vmem [shape: f32[8,1], index: 0, kind: input, shape index: {}]   ;;  %s641_s1 = inlined_call_operand.vmem [shape: f32[8,1], index: 1, kind: input, shape index: {}]   ;;  %s642_s2 = inlined_call_operand.vmem [shape: f32[8,256], index: 2, kind: input, shape index: {}]   ;;  %s643_s3 = inlined_call_operand.hbm [shape: f32[8,256], index: 3, kind: output, shape index: {}]  }
   0x1   :  { %10 = vsyncpa [#allocation3 + $0x1], 0  ;;  %s535_s12 = smov 0   ;;  %s537_s13 = smov 0  }
   0x2   :  { %s539_s14 = smov 0   ;;  %s541_s15 = smov 0  }
   0x3   :  { %s543_s16 = smov 0   ;;  %s545_s17 = smov 0  }
   0x4 LB: > { %s365_s18 = sadd.s32 4294967295, %s511_s17   ;;  %s366_s19 = sadd.s32 4294967294, %s511_s17   ;;  %s511_s17 = sphi %s545_s17, %s16_s17   ;;  %s507_s16 = sphi %s543_s16, %s650_s16   ;;  %s503_s15 = sphi %s541_s15, %s649_s15   ;;  %s499_s14 = sphi %s539_s14, %s648_s14   ;;  %s495_s13 = sphi %s537_s13, %s647_s13   ;;  %s491_s12 = sphi %s535_s12, %s646_s12  }
   0x5   : > { %s25_s20 = sadd.s32 1, %s507_s16  ;;  %s117_s21 = sadd.s32 1, %s499_s14 }
   0x6   : > { %p26_p0 = scmp.ge.s32.totalorder %s25_s20, 2  ;;  %p127_p1 = scmp.ne.s32.totalorder %s499_s14, %s495_s13 }
   0x7   : > { %p128_p2 = scmp.eq.s32.totalorder %s365_s18, 1  ;;  %p133_p3 = scmp.ne.s32.totalorder %s495_s13, %s491_s12 }
   0x8   : > { %s652_s20 = smov (%p26_p0, %s25_s20), 0  ;;  %p134_p5 = scmp.eq.s32.totalorder %s366_s19, 1 }
   0x9   : > { %p575_p4 = por %p128_p2, %p127_p1  ;;  %s113_s23 = ssub.s32 %s507_s16, %s652_s20 }
   0xa   : > { %p371_p6 = scmp.ge.s32.totalorder %s511_s17, 1  ;;  %p115_p7 = scmp.eq.s32.totalorder %s113_s23, 0 }
   0xb   : > { %p582_p8 = por %p134_p5, %p133_p3  ;;  %p177_p9 = scmp.lt.s32.totalorder %s511_s17, 3 }
   0xc   : > { %s588_s25 = scalar_select %p115_p7, %s499_s14, %s117_s21  }
   0xd   : > { %p178_p10 = pnand %p371_p6, %p177_p9 }
   0xe   : > { %p222_p11 = scmp.lt.s32.totalorder (!%p178_p10), %s503_s15, 1  ;;  %s209_s4 = sand.u32 (!%p178_p10), 1, %s495_s13  }
   0xf   : > { %181 = sbr.rel (%p178_p10) target bundleno = 165 (0xa5), region = 32  ;;  %s372_s6 = sshll.u32 (!%p178_p10), %s209_s4, 3 }
  0x10   : > { %s375_s10 = sshll.u32 (!%p178_p10), %s503_s15, 7  ;;  %s211_s11 = scalar_lea.vmem (!%p178_p10), [#allocation2], %s372_s6 }
  0x11   : > { %s260_s18 = sshll.u32 (!%p178_p10), %s211_s11, 4  ;;  %s258_s23 = scalar_lea.hbm (!%p178_p10), %s643_s3, %s375_s10  ;;  %s261_s18 = int_to_ptr.vmem [resolvable:$true] %s260_s18 }
  0x12   : > { %s245_s26 = scalar_lea.sflag (!%p178_p10), [#allocation3], %s209_s4  ;;  %s435_s27 = scalar_lea.vmem (!%p178_p10), %s261_s18, 128 }
  0x13   : > { %p436_p12 = scmp.ne.s32.totalorder (!%p178_p10), %s261_s18, %s435_s27  ;;  %s514_s28 = smov (!%p178_p10), [#allocation2]  }
  0x14   : > { %v229_v0 = vld [vmem:[%s640_s0] sm:$0xff]  ;;  %v513_v1 = vmov 0   ;;  %s223_s30 = scalar_select %p222_p11, %s503_s15, 1 }
  0x15   : > { %434 = vset.pattern.permute.xlu0 %v513_v1  ;;  %v236_v2 = vld [vmem:[%s641_s1] sm:$0xff]  ;;  %p437_p13 = pnand %p436_p12, %p575_p4  ;;  %s439_s29 = sshll.u32 %s514_s28, 4  ;;  %s440_s29 = int_to_ptr.vmem [resolvable:$false] %s439_s29 }
  0x16   : > { %232 = vperm.xlu0 %434, %v229_v0   ;;  %s373_s5 = sshll.u32 %s223_s30, 3  ;;  %s441_s15 = scalar_lea.vmem %s440_s29, 256 }
  0x17   : > { %s227_s9 = scalar_lea.vmem %s642_s2, %s373_s5  ;;  %p438_p0 = pneg %p437_p13 }
  0x18   : > { %v228_v4 = vld [vmem:[%s227_s9] sm:$0xff]  ;;  %p442_p1 = scmp.lt.s32.totalorder %s261_s18, %s440_s29  ;;  %p443_p2 = scmp.lt.s32.totalorder %s441_s15, %s435_s27 }
  0x1a   : > { %239 = vperm.xlu0 %434, %v236_v2   ;;  %p444_p3 = por %p443_p2, %p442_p1 }
  0x1c   : > { %p445_p5 = pnand %p444_p3, %p438_p0 }
  0x91   : > { %v233_v3 = vpop.permute.xlu0 %232 }
  0x92   : > { %v235_v5 = vmul.f32 %v233_v3, %v228_v4 }
  0x95   : > { %v240_v6 = vpop.permute.xlu0 %239 }
  0x96   : > { %v242_v7 = vadd.f32 %v240_v6, %v235_v5 }
  0x98   : > { %243 = vst [vmem:[%s211_s11] sm:$0xff] %v242_v7 }
  0x99   : > { %448 = shalt.err (!%p445_p5)
}
  0x9a   : > { %s449_s30 = scalar_lea.hbm %s258_s23, 128  ;;  %s453_s6 = scalar_lea.hbm %s643_s3, 256 }
  0x9b   : > { %p450_p6 = scmp.ne.s32.totalorder %s258_s23, %s449_s30  ;;  %p454_p10 = scmp.lt.s32.totalorder %s258_s23, %s643_s3 }
  0x9c   : > { %p455_p11 = scmp.lt.s32.totalorder %s453_s6, %s449_s30 }
  0x9d   : > { %p451_p7 = pnand %p450_p6, %p575_p4 }
  0x9e   : > { %p456_p12 = por %p455_p11, %p454_p10 }
  0x9f   : > { %p452_p9 = pneg %p451_p7 }
  0xa1   : > { %p457_p13 = pnand %p456_p12, %p452_p9 }
  0xa3   : > { %460 = shalt.err (!%p457_p13)
}
  0xa4   : > { %378 = dma.vmem_to_hbm [thread:$0]  (%p575_p4), %s261_s18, 128, %s258_s23, %s245_s26  }
  0xa5 PF: > { %p384_p0 = scmp.ge.s32.totalorder %s511_s17, 2  ;;  %s272_s9 = sand.u32 1, %s491_s12  }
  0xa6   : > { %s273_s10 = scalar_lea.sflag [#allocation3], %s272_s9 }
  0xa7   : > { %p381_p1 = pnand %p384_p0, %p582_p8 }
  0xa9   : > { %p382_p2 = pneg %p381_p1 }
  0xab   : > { %486 = dma.done.wait (%p382_p2), %s273_s10, 128  }
  0xac   : > { %488 = vsyncadd (%p382_p2), %s273_s10, 4294967168  ;;  %s16_s17 = sadd.s32 1, %s511_s17   ;;  %s646_s12 = smov %s495_s13 }
  0xad   : > { %p13_p3 = scmp.ge.s32.totalorder %s16_s17, 4   ;;  %s647_s13 = smov %s499_s14 }
  0xae   : > { %s648_s14 = smov %s588_s25  ;;  %s649_s15 = smov %s507_s16 }
  0xaf   : > { %s650_s16 = smov %s652_s20  ;;  %15 = sbr.rel (!%p13_p3) target bundleno = 4 (0x4), region = 73 }
  0xb4   :  { %278 = vsyncpa [#allocation3], 1 }
  0xb5   :  { %280 = vsyncpa [#allocation3 + $0x1], 1 }

</bundles_post_ra>
